<compile_context>
chip_gen: v7x
topology: tpu7x:2x2x1
jax: 0.10.0
libtpu: 0.0.40
codegen_flags: <defaults>
</compile_context>

<pallas_src>
import math

import jax
import jax.numpy as jnp
from jax import lax
from jax.experimental import pallas as pl
from jax.experimental.pallas import tpu as pltpu


def betbot_kernel(idx_ref, emb_ref, w_mu_ref, w_ls_ref, w_eps_ref,
                  b_mu_ref, b_ls_ref, b_eps_ref, out_ref):
    """idx_ref: (Bp, 2) i32 VMEM; emb_ref: (V, E) f32 VMEM;
    w_*: (OUT, 2E) f32 VMEM (PyTorch-native (out_features, in_features), lane-dense);
    b_*: (1, OUT) f32 VMEM; out_ref: (Bp, OUT) f32 VMEM."""
    V, E = emb_ref.shape
    Bp = out_ref.shape[0]

    # --- BayesLinear sampling on the lane-dense (OUT, IN) layout (VPU + EUP) ---
    w = w_mu_ref[...] + jnp.exp(w_ls_ref[...]) * w_eps_ref[...]        # (OUT, 2E)
    bias = b_mu_ref[...] + jnp.exp(b_ls_ref[...]) * b_eps_ref[...]     # (1, OUT)
    w0 = w[:, :E]                                                      # (OUT, E) tile-aligned slice
    w1 = w[:, E:]                                                      # (OUT, E)

    # --- Embedding gather as one-hot matmuls on the MXU -----------------------
    idx = idx_ref[...]                                                 # (Bp, 2) i32
    col = lax.broadcasted_iota(jnp.int32, (Bp, V), 1)                  # (Bp, V)
    oh0 = (col == idx[:, 0:1]).astype(jnp.float32)                     # (Bp, V)
    oh1 = (col == idx[:, 1:2]).astype(jnp.float32)
    g0 = jnp.dot(oh0, emb_ref[...], preferred_element_type=jnp.float32)  # (Bp, E)
    g1 = jnp.dot(oh1, emb_ref[...], preferred_element_type=jnp.float32)  # (Bp, E)

    # --- Flatten([e0, e1]) @ W.T == e0 @ W[:, :E].T + e1 @ W[:, E:].T ----------
    dn = (((1,), (1,)), ((), ()))      # contract last dims of both (trans_b, no transpose)
    out = (lax.dot_general(g0, w0, dn, preferred_element_type=jnp.float32)
           + lax.dot_general(g1, w1, dn, preferred_element_type=jnp.float32)
           + bias)                                                     # (Bp, OUT)
    out_ref[...] = out                                                 # single full-block store


def betbot_forward(idx, emb, w_mu, w_ls, w_eps, b_mu, b_ls, b_eps):
    """idx: (B, 2) int; emb: (V, E) f32; w_*: (OUT, 2E) f32 (PyTorch layout);
    b_*: (1, OUT) f32. Returns (B, OUT) f32."""
    B, S = idx.shape
    assert S == 2
    OUT = w_mu.shape[0]
    V, E = emb.shape

    # Pad batch to a sublane-full multiple of 8 (padded rows use index 0; sliced off).
    Bp = max(8, ((B + 7) // 8) * 8)
    idx_p = jnp.zeros((Bp, S), jnp.int32).at[:B].set(idx.astype(jnp.int32))

    flops = 2 * (2 * Bp * V * E) + 2 * (2 * Bp * E * OUT)
    bytes_accessed = 4 * (idx_p.size + emb.size + 3 * w_mu.size
                          + 3 * b_mu.size + Bp * OUT)
    vmem = pl.BlockSpec(memory_space=pltpu.MemorySpace.VMEM)

    out = pl.pallas_call(
        betbot_kernel,
        out_shape=jax.ShapeDtypeStruct((Bp, OUT), jnp.float32),
        in_specs=[vmem] * 8,
        out_specs=vmem,
        cost_estimate=pl.CostEstimate(
            flops=flops,
            transcendentals=w_mu.size + b_mu.size,
            bytes_accessed=bytes_accessed),
    )(idx_p, emb, w_mu, w_ls, w_eps, b_mu, b_ls, b_eps)
    return out[:B]


def betbot_reference(idx, emb, w_mu, w_ls, w_eps, b_mu, b_ls, b_eps):
    """Pure-JAX reference of the PyTorch forward (weights in (OUT, IN) layout)."""
    e = jnp.take(emb, idx, axis=0)                       # (B, 2, E)
    flat = e.reshape(e.shape[0], -1)                     # (B, 2E)
    w = w_mu + jnp.exp(w_ls) * w_eps                     # (OUT, 2E)
    b = b_mu + jnp.exp(b_ls) * b_eps                     # (1, OUT)
    return flat @ w.T + b


if __name__ == "__main__":
    # --- deterministic synthetic parameters -------------------------------
    num_characters = 63
    V = num_characters + 1        # Embedding(num_embeddings=num_characters+1)
    E = 1024                      # e_dim from the module
    IN = 2 * E                    # Flatten of (2, E)
    OUT = 2
    B = 2                         # batch
    prior_sigma = 0.1

    key = jax.random.PRNGKey(0)
    k_emb, k_wmu, k_bmu, k_weps, k_beps, k_idx = jax.random.split(key, 6)

    # nn.Embedding default init: N(0, 1)
    emb = jax.random.normal(k_emb, (V, E), dtype=jnp.float32)

    # torchbnn.BayesLinear init: mu ~ U(-stdv, stdv), log_sigma = log(prior_sigma)
    # Weights kept in PyTorch-native (out_features, in_features) layout.
    stdv = 1.0 / math.sqrt(IN)
    w_mu = jax.random.uniform(k_wmu, (OUT, IN), jnp.float32, -stdv, stdv)
    w_ls = jnp.full((OUT, IN), math.log(prior_sigma), dtype=jnp.float32)
    b_mu = jax.random.uniform(k_bmu, (1, OUT), jnp.float32, -stdv, stdv)
    b_ls = jnp.full((1, OUT), math.log(prior_sigma), dtype=jnp.float32)

    # BayesLinear samples eps ~ N(0,1) each forward; sampled deterministically here.
    w_eps = jax.random.normal(k_weps, (OUT, IN), dtype=jnp.float32)
    b_eps = jax.random.normal(k_beps, (1, OUT), dtype=jnp.float32)

    # --- input: (B, 2) character indices ----------------------------------
    idx = jax.random.randint(k_idx, (B, 2), 0, V, dtype=jnp.int32)

    out = betbot_forward(idx, emb, w_mu, w_ls, w_eps, b_mu, b_ls, b_eps)
    out = jax.block_until_ready(out)

    ref = betbot_reference(idx, emb, w_mu, w_ls, w_eps, b_mu, b_ls, b_eps)
    assert out.shape == (B, OUT)
    assert jnp.allclose(out, ref, atol=1e-4, rtol=1e-4), (out, ref)

    print("KERNEL_OK")
</pallas_src>

<mosaic_0001>
module attributes {stable_mosaic.version = 11 : i64} {
  func.func @betbot_kernel(%arg0: memref<8x2xi32, #tpu.memory_space<vmem>>, %arg1: memref<64x1024xf32, #tpu.memory_space<vmem>>, %arg2: memref<2x2048xf32, #tpu.memory_space<vmem>>, %arg3: memref<2x2048xf32, #tpu.memory_space<vmem>>, %arg4: memref<2x2048xf32, #tpu.memory_space<vmem>>, %arg5: memref<1x2xf32, #tpu.memory_space<vmem>>, %arg6: memref<1x2xf32, #tpu.memory_space<vmem>>, %arg7: memref<1x2xf32, #tpu.memory_space<vmem>>, %arg8: memref<8x2xf32, #tpu.memory_space<vmem>>) attributes {dimension_semantics = [], scalar_prefetch = 0 : i64, scratch_operands = 0 : i64, tpu.core_type = #tpu.core_type<tc>} {
    %c0 = arith.constant 0 : index
    %c0_0 = arith.constant 0 : index
    %0 = vector.load %arg2[%c0, %c0_0] : memref<2x2048xf32, #tpu.memory_space<vmem>>, vector<2x2048xf32>
    %c0_1 = arith.constant 0 : index
    %c0_2 = arith.constant 0 : index
    %1 = vector.load %arg3[%c0_1, %c0_2] : memref<2x2048xf32, #tpu.memory_space<vmem>>, vector<2x2048xf32>
    %2 = math.exp %1 : vector<2x2048xf32>
    %c0_3 = arith.constant 0 : index
    %c0_4 = arith.constant 0 : index
    %3 = vector.load %arg4[%c0_3, %c0_4] : memref<2x2048xf32, #tpu.memory_space<vmem>>, vector<2x2048xf32>
    %4 = arith.mulf %2, %3 : vector<2x2048xf32>
    %5 = arith.addf %0, %4 : vector<2x2048xf32>
    %c0_5 = arith.constant 0 : index
    %c0_6 = arith.constant 0 : index
    %6 = vector.load %arg5[%c0_5, %c0_6] : memref<1x2xf32, #tpu.memory_space<vmem>>, vector<1x2xf32>
    %c0_7 = arith.constant 0 : index
    %c0_8 = arith.constant 0 : index
    %7 = vector.load %arg6[%c0_7, %c0_8] : memref<1x2xf32, #tpu.memory_space<vmem>>, vector<1x2xf32>
    %8 = math.exp %7 : vector<1x2xf32>
    %c0_9 = arith.constant 0 : index
    %c0_10 = arith.constant 0 : index
    %9 = vector.load %arg7[%c0_9, %c0_10] : memref<1x2xf32, #tpu.memory_space<vmem>>, vector<1x2xf32>
    %10 = arith.mulf %8, %9 : vector<1x2xf32>
    %11 = arith.addf %6, %10 : vector<1x2xf32>
    %12 = vector.extract_strided_slice %5 {offsets = [0, 0], sizes = [2, 1024], strides = [1, 1]} : vector<2x2048xf32> to vector<2x1024xf32>
    %13 = vector.extract_strided_slice %5 {offsets = [0, 1024], sizes = [2, 1024], strides = [1, 1]} : vector<2x2048xf32> to vector<2x1024xf32>
    %c0_11 = arith.constant 0 : index
    %c0_12 = arith.constant 0 : index
    %14 = vector.load %arg0[%c0_11, %c0_12] : memref<8x2xi32, #tpu.memory_space<vmem>>, vector<8x2xi32>
    %15 = tpu.iota {dimensions = array<i32: 1>} : vector<8x64xi32>
    %16 = vector.extract_strided_slice %14 {offsets = [0, 0], sizes = [8, 1], strides = [1, 1]} : vector<8x2xi32> to vector<8x1xi32>
    %17 = vector.broadcast %16 : vector<8x1xi32> to vector<8x64xi32>
    %18 = arith.cmpi eq, %15, %17 : vector<8x64xi32>
    %19 = arith.extui %18 : vector<8x64xi1> to vector<8x64xi32>
    %20 = arith.sitofp %19 : vector<8x64xi32> to vector<8x64xf32>
    %21 = vector.extract_strided_slice %14 {offsets = [0, 1], sizes = [8, 1], strides = [1, 1]} : vector<8x2xi32> to vector<8x1xi32>
    %22 = vector.broadcast %21 : vector<8x1xi32> to vector<8x64xi32>
    %23 = arith.cmpi eq, %15, %22 : vector<8x64xi32>
    %24 = arith.extui %23 : vector<8x64xi1> to vector<8x64xi32>
    %25 = arith.sitofp %24 : vector<8x64xi32> to vector<8x64xf32>
    %c0_13 = arith.constant 0 : index
    %c0_14 = arith.constant 0 : index
    %26 = vector.load %arg1[%c0_13, %c0_14] : memref<64x1024xf32, #tpu.memory_space<vmem>>, vector<64x1024xf32>
    %cst = arith.constant dense<0.000000e+00> : vector<8x1024xf32>
    %27 = tpu.matmul %20, %26, %cst {dimension_numbers = #tpu.dot_dimension_numbers<[1], [0], [0], [1], [0, 0, 1, 1], [], []>} : vector<8x64xf32>, vector<64x1024xf32>, vector<8x1024xf32> -> vector<8x1024xf32>
    %c0_15 = arith.constant 0 : index
    %c0_16 = arith.constant 0 : index
    %28 = vector.load %arg1[%c0_15, %c0_16] : memref<64x1024xf32, #tpu.memory_space<vmem>>, vector<64x1024xf32>
    %cst_17 = arith.constant dense<0.000000e+00> : vector<8x1024xf32>
    %29 = tpu.matmul %25, %28, %cst_17 {dimension_numbers = #tpu.dot_dimension_numbers<[1], [0], [0], [1], [0, 0, 1, 1], [], []>} : vector<8x64xf32>, vector<64x1024xf32>, vector<8x1024xf32> -> vector<8x1024xf32>
    %cst_18 = arith.constant dense<0.000000e+00> : vector<8x2xf32>
    %30 = tpu.matmul %27, %12, %cst_18 {dimension_numbers = #tpu.dot_dimension_numbers<[1], [1], [0], [0], [0, 0, 1, 0], [], []>} : vector<8x1024xf32>, vector<2x1024xf32>, vector<8x2xf32> -> vector<8x2xf32>
    %cst_19 = arith.constant dense<0.000000e+00> : vector<8x2xf32>
    %31 = tpu.matmul %29, %13, %cst_19 {dimension_numbers = #tpu.dot_dimension_numbers<[1], [1], [0], [0], [0, 0, 1, 0], [], []>} : vector<8x1024xf32>, vector<2x1024xf32>, vector<8x2xf32> -> vector<8x2xf32>
    %32 = arith.addf %30, %31 : vector<8x2xf32>
    %33 = vector.broadcast %11 : vector<1x2xf32> to vector<8x2xf32>
    %34 = arith.addf %32, %33 : vector<8x2xf32>
    %c0_20 = arith.constant 0 : index
    %c0_21 = arith.constant 0 : index
    %35 = vector.load %arg8[%c0_20, %c0_21] : memref<8x2xf32, #tpu.memory_space<vmem>>, vector<8x2xf32>
    tpu.vector_store %arg8[%c0_20, %c0_21], %34 {strides = array<i32>} : memref<8x2xf32, #tpu.memory_space<vmem>>, vector<8x2xf32>,
    return
  }
}

</mosaic_0001>

<bundles_post_ra>
// kernel: tpu_custom_call.1
= control target key start
LH: loop header
LB: loop body
LE: loop exit
PB: predicated region body
PF: predicated region fallthrough
CT: control target
= control target key end

     0   :  { %13 = vsyncpa [#allocation3], 0  ;;  %s1952_s0 = inlined_call_operand.vmem [shape: s32[8,2], index: 0, kind: input, shape index: {}]   ;;  %s1953_s1 = inlined_call_operand.hbm [shape: f32[64,1024], index: 1, kind: input, shape index: {}]   ;;  %s1954_s2 = inlined_call_operand.hbm [shape: f32[2,2048], index: 2, kind: input, shape index: {}]   ;;  %s1955_s3 = inlined_call_operand.hbm [shape: f32[2,2048], index: 3, kind: input, shape index: {}]   ;;  %s1956_s4 = inlined_call_operand.hbm [shape: f32[2,2048], index: 4, kind: input, shape index: {}]   ;;  %s1957_s5 = inlined_call_operand.vmem [shape: f32[1,2], index: 5, kind: input, shape index: {}]   ;;  %s1958_s6 = inlined_call_operand.vmem [shape: f32[1,2], index: 6, kind: input, shape index: {}]   ;;  %s1959_s7 = inlined_call_operand.vmem [shape: f32[1,2], index: 7, kind: input, shape index: {}]   ;;  %s1960_s8 = inlined_call_operand.vmem [shape: f32[8,2], index: 8, kind: output, shape index: {}]  }
   0x1   :  { %14 = vsyncpa [#allocation5], 0 }
   0x2   :  { %15 = vsyncpa [#allocation8], 0  ;;  %s1685_s27 = smov [#allocation4]   ;;  %s1686_s29 = smov [#allocation2]  }
   0x3   :  { %s36_s28 = sshll.u32 %s1685_s27, 4  ;;  %s23_s30 = sshll.u32 %s1686_s29, 4  ;;  %s37_s28 = int_to_ptr.vmem [resolvable:$true] %s36_s28  ;;  %s1740_s30 = int_to_ptr.vmem [resolvable:$true] %s23_s30 }
   0x4   :  { %s1591_s11 = scalar_lea.hbm %s1954_s2, 512 }
   0x5   :  { %p1592_p0 = scmp.ne.s32.totalorder %s1954_s2, %s1591_s11  ;;  %p1595_p1 = scmp.lt.u32.totalorder %s1591_s11, %s1954_s2 }
   0x7   :  { %p1597_p2 = pnand %p1595_p1, %p1592_p0 }
   0x9   :  { %1600 = shalt.err (!%p1597_p2)
}
   0xa   :  { %s1601_s16 = scalar_lea.vmem %s37_s28, 512  ;;  %p1606_p4 = scmp.lt.s32.totalorder %s37_s28, %s37_s28 }
   0xb   :  { %p1602_p3 = scmp.ne.s32.totalorder %s37_s28, %s1601_s16  ;;  %p1607_p5 = scmp.lt.s32.totalorder %s1601_s16, %s1601_s16 }
   0xd   :  { %p1608_p6 = por %p1607_p5, %p1606_p4 }
   0xf   :  { %p1609_p7 = pnand %p1608_p6, %p1602_p3 }
  0x11   :  { %1612 = shalt.err (!%p1609_p7)
}
  0x12   :  { %39 = dma.hbm_to_vmem [thread:$0]  %s1954_s2, 512, %s37_s28, [#allocation5]  }
  0x13   :  { %s1613_s21 = scalar_lea.hbm %s1953_s1, 8192 }
  0x14   :  { %p1614_p8 = scmp.ne.s32.totalorder %s1953_s1, %s1613_s21  ;;  %p1617_p9 = scmp.lt.u32.totalorder %s1613_s21, %s1953_s1 }
  0x16   :  { %p1619_p10 = pnand %p1617_p9, %p1614_p8 }
  0x18   :  { %1622 = shalt.err (!%p1619_p10)
}
  0x19   :  { %s1623_s26 = scalar_lea.vmem %s1740_s30, 8192  ;;  %p1628_p12 = scmp.lt.s32.totalorder %s1740_s30, %s1740_s30 }
  0x1a   :  { %p1624_p11 = scmp.ne.s32.totalorder %s1740_s30, %s1623_s26  ;;  %p1629_p13 = scmp.lt.s32.totalorder %s1623_s26, %s1623_s26 }
  0x1c   :  { %p1630_p0 = por %p1629_p13, %p1628_p12 }
  0x1e   :  { %p1631_p1 = pnand %p1630_p0, %p1624_p11 }
  0x20   :  { %1634 = shalt.err (!%p1631_p1)
}
  0x21   :  { %s1687_s2 = smov 1024   ;;  %s1688_s27 = smov 64  }
  0x22   :  { %29 = dma.hbm_to_vmem [thread:$0]  %s1953_s1, 8192, %s1740_s30, [#allocation3], %s1687_s2, %s1687_s2, %s1688_s27  }
  0x23   :  { %s1689_s9 = smov [#allocation6]   ;;  %s1690_s11 = smov [#allocation7]  }
  0x24   :  { %s46_s10 = sshll.u32 %s1689_s9, 4  ;;  %s56_s12 = sshll.u32 %s1690_s11, 4  ;;  %s47_s10 = int_to_ptr.vmem [resolvable:$true] %s46_s10  ;;  %s57_s12 = int_to_ptr.vmem [resolvable:$true] %s56_s12 }
  0x25   :  { %s1635_s15 = scalar_lea.hbm %s1955_s3, 512 }
  0x26   :  { %p1636_p2 = scmp.ne.s32.totalorder %s1955_s3, %s1635_s15  ;;  %p1639_p3 = scmp.lt.u32.totalorder %s1635_s15, %s1955_s3 }
  0x28   :  { %p1641_p4 = pnand %p1639_p3, %p1636_p2 }
  0x2a   :  { %1644 = shalt.err (!%p1641_p4)
}
  0x2b   :  { %s1645_s1 = scalar_lea.vmem %s47_s10, 512  ;;  %p1650_p6 = scmp.lt.s32.totalorder %s47_s10, %s47_s10 }
  0x2c   :  { %p1646_p5 = scmp.ne.s32.totalorder %s47_s10, %s1645_s1  ;;  %p1651_p7 = scmp.lt.s32.totalorder %s1645_s1, %s1645_s1 }
  0x2e   :  { %p1652_p8 = por %p1651_p7, %p1650_p6 }
  0x30   :  { %p1653_p9 = pnand %p1652_p8, %p1646_p5 }
  0x32   :  { %1656 = shalt.err (!%p1653_p9)
}
  0x33   :  { %49 = dma.hbm_to_vmem [thread:$0]  %s1955_s3, 512, %s47_s10, [#allocation5]  }
  0x34   :  { %s1657_s23 = scalar_lea.hbm %s1956_s4, 512 }
  0x35   :  { %p1658_p10 = scmp.ne.s32.totalorder %s1956_s4, %s1657_s23  ;;  %p1661_p11 = scmp.lt.u32.totalorder %s1657_s23, %s1956_s4 }
  0x37   :  { %p1663_p12 = pnand %p1661_p11, %p1658_p10 }
  0x39   :  { %1666 = shalt.err (!%p1663_p12)
}
  0x3a   :  { %s1667_s27 = scalar_lea.vmem %s57_s12, 512  ;;  %p1672_p0 = scmp.lt.s32.totalorder %s57_s12, %s57_s12 }
  0x3b   :  { %p1668_p13 = scmp.ne.s32.totalorder %s57_s12, %s1667_s27  ;;  %p1673_p1 = scmp.lt.s32.totalorder %s1667_s27, %s1667_s27 }
  0x3d   :  { %p1674_p2 = por %p1673_p1, %p1672_p0 }
  0x3f   :  { %p1675_p3 = pnand %p1674_p2, %p1668_p13 }
  0x41   :  { %1678 = shalt.err (!%p1675_p3)
}
  0x42   :  { %59 = dma.hbm_to_vmem [thread:$0]  %s1956_s4, 512, %s57_s12, [#allocation8]  }
  0x43   :  { %1679 = dma.done.wait [#allocation3], 8192  }
  0x44   :  { %1680 = vsyncadd [#allocation3], 4294959104 }
  0x45   :  { %1681 = dma.done.wait [#allocation5], 1024  }
  0x46   :  { %1682 = vsyncadd [#allocation5], 4294966272 }
  0x47   :  { %1683 = dma.done.wait [#allocation8], 512  }
  0x48   :  { %1684 = vsyncadd [#allocation8], 4294966784  ;;  %v1691_v0 = vmov 0   ;;  %v1692_v1 = vmov 0.0   ;;  %v113_v2 = vld [vmem:[%s1952_s0] sm:$0xff]  ;;  %v129_v3 = vld [vmem:[#allocation2 + $0x8] sm:$0xff]  ;;  %v114_v58 = vlaneseq }
  0x49   :  { %1579 = vset.pattern.permute.xlu0 %v1691_v0  ;;  %260 = vmatprep.mubr.f32.mxu0 %v1692_v1  ;;  %v137_v4 = vld [vmem:[#allocation2 + $0x48] sm:$0xff]  ;;  %v131_v6 = vld [vmem:[#allocation2 + $0x18] sm:$0xff]  ;;  %v128_v8 = vld [vmem:[#allocation2] sm:$0xff]  ;;  %v1693_v22 = vmov 1   ;;  %vm192_vm0 = vcmask 523264   ;;  %vm1422_vm3 = vcmask 15360  }
  0x4a   :  { %331 = vmatprep.mubr.f32.mxu1 %v1692_v1  ;;  %117 = vperm.xlu0 %1579, %v113_v2   ;;  %v1800_v5 = vpack.c.bf16 %v137_v4, %v129_v3  ;;  %v139_v7 = vld [vmem:[#allocation2 + $0x58] sm:$0xff]  ;;  %v136_v10 = vld [vmem:[#allocation2 + $0x40] sm:$0xff]  ;;  %v130_v11 = vld [vmem:[#allocation2 + $0x10] sm:$0xff]  ;;  %v1855_v61 = vand.u32 127, %v114_v58 }
  0x4b   :  { %v1802_v9 = vpack.c.bf16 %v139_v7, %v131_v6  ;;  %v138_v12 = vld [vmem:[#allocation2 + $0x50] sm:$0xff]  ;;  %v1805_v13 = vpack.c.bf16 %v136_v10, %v128_v8  ;;  %v145_v15 = vld [vmem:[#allocation2 + $0x88] sm:$0xff]  ;;  %v147_v17 = vld [vmem:[#allocation2 + $0x98] sm:$0xff] }
  0x4c   :  { %1442 = vmatprep.subr.bf16.mxu0 %v1800_v5  ;;  %v1807_v14 = vpack.c.bf16 %v138_v12, %v130_v11  ;;  %v153_v16 = vld [vmem:[#allocation2 + $0xc8] sm:$0xff]  ;;  %v155_v19 = vld [vmem:[#allocation2 + $0xd8] sm:$0xff]  ;;  %v144_v20 = vld [vmem:[#allocation2 + $0x80] sm:$0xff] }
  0x4d   :  { %1458 = vmatprep.subr.bf16.mxu1 %v1802_v9  ;;  %v1810_v18 = vpack.c.bf16 %v153_v16, %v145_v15  ;;  %v152_v21 = vld [vmem:[#allocation2 + $0xc0] sm:$0xff]  ;;  %1444 = vmatpush1.bf16.msra.mxu0 %v1805_v13  ;;  %v1813_v23 = vpack.c.bf16 %v155_v19, %v147_v17  ;;  %v146_v25 = vld [vmem:[#allocation2 + $0x90] sm:$0xff]  ;;  %v161_v27 = vld [vmem:[#allocation2 + $0x108] sm:$0xff] }
  0x4e   :  { %1580 = vset.pattern.permute.xlu0 %v1693_v22  ;;  %v1815_v24 = vpack.c.bf16 %v152_v21, %v144_v20  ;;  %v154_v26 = vld [vmem:[#allocation2 + $0xd0] sm:$0xff]  ;;  %1460 = vmatpush1.bf16.msra.mxu1 %v1807_v14  ;;  %v169_v29 = vld [vmem:[#allocation2 + $0x148] sm:$0xff]  ;;  %v163_v30 = vld [vmem:[#allocation2 + $0x118] sm:$0xff] }
  0x4f   :  { %123 = vperm.xlu0 %1580, %v113_v2   ;;  %v1818_v28 = vpack.c.bf16 %v154_v26, %v146_v25  ;;  %v171_v31 = vld [vmem:[#allocation2 + $0x158] sm:$0xff]  ;;  %1446 = vmatprep.subr.bf16.mxu0 %v1810_v18  ;;  %v1822_v32 = vpack.c.bf16 %v169_v29, %v161_v27  ;;  %v160_v34 = vld [vmem:[#allocation2 + $0x100] sm:$0xff]  ;;  %v162_v36 = vld [vmem:[#allocation2 + $0x110] sm:$0xff] }
  0x50   :  { %1462 = vmatprep.subr.bf16.mxu1 %v1813_v23  ;;  %v1824_v33 = vpack.c.bf16 %v171_v31, %v163_v30  ;;  %v168_v35 = vld [vmem:[#allocation2 + $0x140] sm:$0xff]  ;;  %v170_v37 = vld [vmem:[#allocation2 + $0x150] sm:$0xff]  ;;  %v177_v38 = vld [vmem:[#allocation2 + $0x188] sm:$0xff] }
  0x51   :  { %v185_v39 = vld [vmem:[#allocation2 + $0x1c8] sm:$0xff]  ;;  %1448 = vmatpush1.bf16.msra.mxu0 %v1815_v24  ;;  %v1827_v40 = vpack.c.bf16 %v168_v35, %v160_v34  ;;  %v179_v41 = vld [vmem:[#allocation2 + $0x198] sm:$0xff]  ;;  %v1831_v43 = vpack.c.bf16 %v170_v37, %v162_v36  ;;  %v176_v45 = vld [vmem:[#allocation2 + $0x180] sm:$0xff] }
  0x52   :  { %v187_v42 = vld [vmem:[#allocation2 + $0x1d8] sm:$0xff]  ;;  %1464 = vmatpush1.bf16.msra.mxu1 %v1818_v28  ;;  %1450 = vmatprep.subr.bf16.mxu0 %v1822_v32  ;;  %v1833_v44 = vpack.c.bf16 %v185_v39, %v177_v38  ;;  %v184_v46 = vld [vmem:[#allocation2 + $0x1c0] sm:$0xff]  ;;  %v178_v47 = vld [vmem:[#allocation2 + $0x190] sm:$0xff] }
  0x53   :  { %1466 = vmatprep.subr.bf16.mxu1 %v1824_v33  ;;  %v1836_v48 = vpack.c.bf16 %v187_v42, %v179_v41  ;;  %v186_v49 = vld [vmem:[#allocation2 + $0x1d0] sm:$0xff]  ;;  %v133_v50 = vld [vmem:[#allocation2 + $0x28] sm:$0xff]  ;;  %v135_v52 = vld [vmem:[#allocation2 + $0x38] sm:$0xff]  ;;  %v1839_v54 = vpack.c.bf16 %v184_v46, %v176_v45 }
  0x54   :  { %v141_v51 = vld [vmem:[#allocation2 + $0x68] sm:$0xff]  ;;  %v143_v53 = vld [vmem:[#allocation2 + $0x78] sm:$0xff]  ;;  %v1843_v55 = vpack.c.bf16 %v186_v49, %v178_v47  ;;  %v132_v59 = vld [vmem:[#allocation2 + $0x20] sm:$0xff] }
  0x55   :  { %1452 = vmatpush1.bf16.msra.mxu0 %v1827_v40  ;;  %v1845_v56 = vpack.c.bf16 %v141_v51, %v133_v50  ;;  %v1848_v57 = vpack.c.bf16 %v143_v53, %v135_v52  ;;  %v140_v60 = vld [vmem:[#allocation2 + $0x60] sm:$0xff]  ;;  %v134_v62 = vld [vmem:[#allocation2 + $0x30] sm:$0xff]  ;;  %v149_v0 = vld [vmem:[#allocation2 + $0xa8] sm:$0xff] }
  0x56   :  { %1468 = vmatpush1.bf16.msra.mxu1 %v1831_v43  ;;  %1454 = vmatprep.subr.bf16.mxu0 %v1833_v44  ;;  %v142_v63 = vld [vmem:[#allocation2 + $0x70] sm:$0xff]  ;;  %v157_v2 = vld [vmem:[#allocation2 + $0xe8] sm:$0xff]  ;;  %v151_v3 = vld [vmem:[#allocation2 + $0xb8] sm:$0xff]  ;;  %v1857_v7 = vpack.c.bf16 %v140_v60, %v132_v59 }
  0x57   :  { %1470 = vmatprep.subr.bf16.mxu1 %v1836_v48  ;;  %v159_v4 = vld [vmem:[#allocation2 + $0xf8] sm:$0xff]  ;;  %v1859_v8 = vpack.c.bf16 %v142_v63, %v134_v62  ;;  %v148_v10 = vld [vmem:[#allocation2 + $0xa0] sm:$0xff]  ;;  %v1862_v12 = vpack.c.bf16 %v157_v2, %v149_v0  ;;  %v150_v16 = vld [vmem:[#allocation2 + $0xb0] sm:$0xff] }
  0x58   :  { %v156_v11 = vld [vmem:[#allocation2 + $0xe0] sm:$0xff]  ;;  %v1864_v15 = vpack.c.bf16 %v159_v4, %v151_v3  ;;  %v158_v17 = vld [vmem:[#allocation2 + $0xf0] sm:$0xff]  ;;  %v165_v19 = vld [vmem:[#allocation2 + $0x128] sm:$0xff] }
  0x59   :  { %1456 = vmatpush1.bf16.msra.mxu0 %v1839_v54  ;;  %v173_v21 = vld [vmem:[#allocation2 + $0x168] sm:$0xff]  ;;  %v167_v22 = vld [vmem:[#allocation2 + $0x138] sm:$0xff]  ;;  %v1871_v26 = vpack.c.bf16 %v156_v11, %v148_v10  ;;  %v1873_v27 = vpack.c.bf16 %v158_v17, %v150_v16  ;;  %v164_v29 = vld [vmem:[#allocation2 + $0x120] sm:$0xff] }
  0x5a   :  { %1472 = vmatpush1.bf16.msra.mxu1 %v1843_v55  ;;  %1474 = vmatprep.subr.bf16.mxu0 %v1845_v56  ;;  %v175_v25 = vld [vmem:[#allocation2 + $0x178] sm:$0xff]  ;;  %v172_v30 = vld [vmem:[#allocation2 + $0x160] sm:$0xff]  ;;  %v1877_v31 = vpack.c.bf16 %v173_v21, %v165_v19  ;;  %v166_v35 = vld [vmem:[#allocation2 + $0x130] sm:$0xff] }
  0x5b   :  { %1490 = vmatprep.subr.bf16.mxu1 %v1848_v57  ;;  %v1879_v34 = vpack.c.bf16 %v175_v25, %v167_v22  ;;  %v174_v36 = vld [vmem:[#allocation2 + $0x170] sm:$0xff]  ;;  %v181_v37 = vld [vmem:[#allocation2 + $0x1a8] sm:$0xff]  ;;  %v183_v39 = vld [vmem:[#allocation2 + $0x1b8] sm:$0xff]  ;;  %v1483_v42 = vpack.c.bf16 %v172_v30, %v164_v29 }
  0x5c   :  { %v189_v38 = vld [vmem:[#allocation2 + $0x1e8] sm:$0xff]  ;;  %v191_v41 = vld [vmem:[#allocation2 + $0x1f8] sm:$0xff]  ;;  %v1499_v45 = vpack.c.bf16 %v174_v36, %v166_v35  ;;  %v180_v46 = vld [vmem:[#allocation2 + $0x1a0] sm:$0xff] }
  0x5d   :  { %v1485_v47 = vpack.c.bf16 %v189_v38, %v181_v37  ;;  %v1501_v49 = vpack.c.bf16 %v191_v41, %v183_v39  ;;  %v188_v50 = vld [vmem:[#allocation2 + $0x1e0] sm:$0xff]  ;;  %v182_v51 = vld [vmem:[#allocation2 + $0x1b0] sm:$0xff]  ;;  %v81_v63 = vld [vmem:[#allocation4 + $0x18] sm:$0xff] }
  0x5e   :  { %v190_v52 = vld [vmem:[#allocation2 + $0x1f0] sm:$0xff]  ;;  %v1487_v53 = vpack.c.bf16 %v188_v50, %v180_v46  ;;  %v82_v10 = vld [vmem:[#allocation6] sm:$0xff]  ;;  %v83_v21 = vld [vmem:[#allocation6 + $0x8] sm:$0xff] }
  0x5f   :  { %v1503_v59 = vpack.c.bf16 %v190_v52, %v182_v51  ;;  %v88_v30 = vmul.f32 1.442695, %v83_v21  ;;  %v95_v39 = vld [vmem:[#allocation7 + $0x8] sm:$0xff] }
  0x60   :  { %v79_v51 = vld [vmem:[#allocation4 + $0x8] sm:$0xff] }
  0xc9   :  { %v118_v6 = vpop.permute.xlu0 %117 }
  0xca   :  { %vm119_vm1 = vcmp.eq.s32.totalorder %v1855_v61, %v118_v6 }
  0xcb   :  { %v1431_v20 = vsel %vm119_vm1, 1.0, %v1692_v1 }
  0xcc   :  { %1433 = vmatmul.mubr.msk.f32.vlgmr.msra.gmra.mrb[0].mxu0 %vm192_vm0, %v1431_v20  ;;  %1434 = vmatmul.mubr.msk.f32.vlgmr.msra.gmra.mrb[0].mxu1 %vm192_vm0, %v1431_v20 }
  0xcd   :  { %1476 = vmatpush1.bf16.msra.mxu0 %v1857_v7  ;;  %1492 = vmatpush1.bf16.msra.mxu1 %v1859_v8 }
  0xce   :  { %1478 = vmatprep.subr.bf16.mxu0 %v1862_v12  ;;  %1494 = vmatprep.subr.bf16.mxu1 %v1864_v15 }
  0xcf   :  { %402 = vmatprep.mubr.f32.mxu0 %v1692_v1  ;;  %473 = vmatprep.mubr.f32.mxu1 %v1692_v1 }
  0xd1   :  { %1480 = vmatpush1.bf16.msra.mxu0 %v1871_v26  ;;  %1496 = vmatpush1.bf16.msra.mxu1 %v1873_v27 }
  0xd2   :  { %1482 = vmatprep.subr.bf16.mxu0 %v1877_v31  ;;  %1498 = vmatprep.subr.bf16.mxu1 %v1879_v34 }
  0xd5   :  { %1484 = vmatpush1.bf16.msra.mxu0 %v1483_v42  ;;  %1500 = vmatpush1.bf16.msra.mxu1 %v1499_v45 }
  0xd6   :  { %1486 = vmatprep.subr.bf16.mxu0 %v1485_v47  ;;  %1502 = vmatprep.subr.bf16.mxu1 %v1501_v49 }
  0xd9   :  { %1488 = vmatpush1.bf16.msra.mxu0 %v1487_v53  ;;  %1504 = vmatpush1.bf16.msra.mxu1 %v1503_v59 }
  0xda   :  { %1506 = vmatprep.subr.bf16.mxu0 %v1800_v5  ;;  %1522 = vmatprep.subr.bf16.mxu1 %v1802_v9  ;;  %v124_v5 = vpop.permute.xlu0 %123 }
  0xdb   :  { %vm125_vm2 = vcmp.eq.s32.totalorder %v1855_v61, %v124_v5  ;;  %v97_v61 = vld [vmem:[#allocation7 + $0x18] sm:$0xff] }
  0xdc   :  { %1435 = vmatmul.mubr.msk.f32.vlgmr.msra.gmra.mrb[2].mxu0 %vm192_vm0, %v1431_v20  ;;  %1436 = vmatmul.mubr.msk.f32.vlgmr.msra.gmra.mrb[2].mxu1 %vm192_vm0, %v1431_v20  ;;  %v1432_v9 = vsel %vm125_vm2, 1.0, %v1692_v1  ;;  %v94_v20 = vld [vmem:[#allocation7] sm:$0xff] }
  0xdd   :  { %1508 = vmatpush1.bf16.msra.mxu0 %v1805_v13  ;;  %1524 = vmatpush1.bf16.msra.mxu1 %v1807_v14  ;;  %v84_v13 = vld [vmem:[#allocation6 + $0x10] sm:$0xff]  ;;  %v1694_v14 = vmov 1983009808  }
  0xde   :  { %1510 = vmatprep.subr.bf16.mxu0 %v1810_v18  ;;  %1526 = vmatprep.subr.bf16.mxu1 %v1813_v23  ;;  %v771_v18 = vunpack.c.l.s4 %v1694_v14 }
  0xdf   :  { %547 = vmatprep.mubr.f32.mxu0 %v1692_v1  ;;  %618 = vmatprep.mubr.f32.mxu1 %v1692_v1 }
  0xe0   :  { %v772_v23 = vunpack.c.0.s8 %v771_v18 }
  0xe1   :  { %1512 = vmatpush1.bf16.msra.mxu0 %v1815_v24  ;;  %1528 = vmatpush1.bf16.msra.mxu1 %v1818_v28  ;;  %v1926_v24 = vshrl.u32 %v114_v58, 7  ;;  %v96_v28 = vld [vmem:[#allocation7 + $0x10] sm:$0xff] }
  0xe2   :  { %1514 = vmatprep.subr.bf16.mxu0 %v1822_v32  ;;  %1530 = vmatprep.subr.bf16.mxu1 %v1824_v33  ;;  %v80_v33 = vld [vmem:[#allocation4 + $0x10] sm:$0xff] }
  0xe5   :  { %1516 = vmatpush1.bf16.msra.mxu0 %v1827_v40  ;;  %1532 = vmatpush1.bf16.msra.mxu1 %v1831_v43  ;;  %v1929_v40 = vsub.s32 %v772_v23, %v1926_v24 }
  0xe6   :  { %1518 = vmatprep.subr.bf16.mxu0 %v1833_v44  ;;  %1534 = vmatprep.subr.bf16.mxu1 %v1836_v48  ;;  %v85_v48 = vld [vmem:[#allocation6 + $0x18] sm:$0xff] }
  0xe9   :  { %1520 = vmatpush1.bf16.msra.mxu0 %v1839_v54  ;;  %1536 = vmatpush1.bf16.msra.mxu1 %v1843_v55  ;;  %v92_v54 = vmul.f32 1.442695, %v85_v48 }
  0xea   :  { %1538 = vmatprep.subr.bf16.mxu0 %v1845_v56  ;;  %1554 = vmatprep.subr.bf16.mxu1 %v1848_v57 }
  0xec   :  { %1437 = vmatmul.mubr.msk.f32.vlgmr.msra.gmra.mrb[4].mxu0 %vm192_vm0, %v1432_v9  ;;  %1438 = vmatmul.mubr.msk.f32.vlgmr.msra.gmra.mrb[4].mxu1 %vm192_vm0, %v1432_v9 }
  0xed   :  { %1540 = vmatpush1.bf16.msra.mxu0 %v1857_v7  ;;  %1556 = vmatpush1.bf16.msra.mxu1 %v1859_v8 }
  0xee   :  { %1542 = vmatprep.subr.bf16.mxu0 %v1862_v12  ;;  %1558 = vmatprep.subr.bf16.mxu1 %v1864_v15  ;;  %v86_v15 = vmul.f32 1.442695, %v82_v10 }
  0xef   :  { %689 = vmatprep.mubr.f32.mxu0 %v1692_v1  ;;  %760 = vmatprep.mubr.f32.mxu1 %v1692_v1  ;;  %v90_v1 = vmul.f32 1.442695, %v84_v13 }
  0xf1   :  { %1544 = vmatpush1.bf16.msra.mxu0 %v1871_v26  ;;  %1560 = vmatpush1.bf16.msra.mxu1 %v1873_v27  ;;  %1581 = vpow2.f32 %v90_v1 }
  0xf2   :  { %1546 = vmatprep.subr.bf16.mxu0 %v1877_v31  ;;  %1562 = vmatprep.subr.bf16.mxu1 %v1879_v34  ;;  %1583 = vpow2.f32 %v92_v54  ;;  %v78_v31 = vld [vmem:[#allocation4] sm:$0xff] }
  0xf3   :  { %1585 = vpow2.f32 %v86_v15 }
  0xf4   :  { %1587 = vpow2.f32 %v88_v30 }
  0xf5   :  { %1548 = vmatpush1.bf16.msra.mxu0 %v1483_v42  ;;  %1564 = vmatpush1.bf16.msra.mxu1 %v1499_v45 }
  0xf6   :  { %1550 = vmatprep.subr.bf16.mxu0 %v1485_v47  ;;  %1566 = vmatprep.subr.bf16.mxu1 %v1501_v49 }
  0xf9   :  { %1552 = vmatpush1.bf16.msra.mxu0 %v1487_v53  ;;  %1568 = vmatpush1.bf16.msra.mxu1 %v1503_v59 }
  0xfb   :  { %v1582_v32 = vpop.eup %1581 }
  0xfc   :  { %1439 = vmatmul.mubr.msk.f32.vlgmr.msra.gmra.mrb[6].mxu0 %vm192_vm0, %v1432_v9  ;;  %1440 = vmatmul.mubr.msk.f32.vlgmr.msra.gmra.mrb[6].mxu1 %vm192_vm0, %v1432_v9  ;;  %v100_v43 = vmul.f32 %v1582_v32, %v96_v28  ;;  %v1584_v62 = vpop.eup %1583  ;;  %v107_v28 = vld [vmem:[%s1958_s6] sm:$0x1] }
  0xfd   :  { %v101_v0 = vmul.f32 %v1584_v62, %v97_v61  ;;  %v1586_v19 = vpop.eup %1585 }
  0xfe   :  { %v104_v44 = vadd.f32 %v100_v43, %v80_v33  ;;  %v98_v29 = vmul.f32 %v1586_v19, %v94_v20  ;;  %v1588_v38 = vpop.eup %1587 }
  0xff   :  { %v105_v2 = vadd.f32 %v101_v0, %v81_v63  ;;  %v99_v50 = vmul.f32 %v1588_v38, %v95_v39  ;;  %v106_v63 = vld [vmem:[%s1957_s5] sm:$0x1] }
 0x100   :  { %v776_v55 = vrot.slane %v104_v44, %v1929_v40  ;;  %v769_v56 = vcombine.high %v104_v44, %v104_v44  ;;  %v102_v34 = vadd.f32 %v98_v29, %v78_v31 }
 0x101   :  { %v793_v3 = vrot.slane %v105_v2, %v1929_v40  ;;  %v786_v4 = vcombine.high %v105_v2, %v105_v2  ;;  %v103_v52 = vadd.f32 %v99_v50, %v79_v51 }
 0x102   :  { %v784_v57 = vcombine.high %v776_v55, %v776_v55  ;;  %v783_v60 = vrot.slane %v769_v56, %v1929_v40  ;;  %v1093_v35 = vcombine.high %v102_v34, %v102_v34  ;;  %v1100_v36 = vrot.slane %v102_v34, %v1929_v40 }
 0x103   :  { %v801_v6 = vcombine.high %v793_v3, %v793_v3  ;;  %v800_v7 = vrot.slane %v786_v4, %v1929_v40  ;;  %v1110_v53 = vcombine.high %v103_v52, %v103_v52  ;;  %v1117_v59 = vrot.slane %v103_v52, %v1929_v40 }
 0x104   :  { %811 = vmatprep.subr.mxu0 %v784_v57  ;;  %v785_v58 = vcombine.high %v783_v60, %v783_v60  ;;  %v1107_v37 = vrot.slane %v1093_v35, %v1929_v40  ;;  %v1108_v47 = vcombine.high %v1100_v36, %v1100_v36 }
 0x105   :  { %812 = vmatpush1.xpose.msra.mxu0 %v776_v55  ;;  %v802_v8 = vcombine.high %v800_v7, %v800_v7  ;;  %v1124_v5 = vrot.slane %v1110_v53, %v1929_v40  ;;  %v1125_v18 = vcombine.high %v1117_v59, %v1117_v59  ;;  %v108_v40 = vmul.f32 1.442695, %v107_v28  ;;  %v110_v55 = vld [vmem:[%s1959_s7] sm:$0x1] }
 0x106   :  { %881 = vmatprep.subr.mxu1 %v785_v58  ;;  %951 = vmatprep.subr.mxu0 %v801_v6  ;;  %v1109_v49 = vcombine.high %v1107_v37, %v1107_v37 }
 0x107   :  { %882 = vmatpush1.xpose.msra.mxu1 %v783_v60  ;;  %v1126_v23 = vcombine.high %v1124_v5, %v1124_v5  ;;  %1589 = vpow2.f32 %v108_v40 }
 0x108   :  { %1021 = vmatprep.subr.mxu1 %v802_v8  ;;  %v1418_v8 = vsub.s32 0, %v1926_v24 }
 0x111   :  { %v1590_v54 = vpop.eup %1589 }
 0x112   :  { %v111_v62 = vmul.f32 %v1590_v54, %v110_v55 }
 0x19f   :  { %v262_v11 = vpop.f32.mrb[0].mxu0  ;;  %v333_v12 = vpop.f32.mrb[0].mxu1 }
 0x1a0   :  { %v264_v16 = vpop.f32.mrb[1].mxu0  ;;  %v335_v17 = vpop.f32.mrb[1].mxu1 }
 0x1af   :  { %v404_v22 = vpop.f32.mrb[2].mxu0  ;;  %v475_v25 = vpop.f32.mrb[2].mxu1 }
 0x1b0   :  { %v406_v26 = vpop.f32.mrb[3].mxu0  ;;  %v477_v27 = vpop.f32.mrb[3].mxu1 }
 0x1bf   :  { %v549_v41 = vpop.f32.mrb[4].mxu0  ;;  %v620_v42 = vpop.f32.mrb[4].mxu1 }
 0x1c0   :  { %v551_v45 = vpop.f32.mrb[5].mxu0  ;;  %v622_v46 = vpop.f32.mrb[5].mxu1 }
 0x1c1   :  { %875 = vmatprep.mubr.f32.mxu0 %v551_v45  ;;  %945 = vmatprep.mubr.f32.mxu1 %v622_v46 }
 0x1c2   :  { %876 = vmatmul.mubr.f32.vlgmr.msra.gmra.mrb[8].mxu0 %v549_v41  ;;  %946 = vmatmul.mubr.f32.vlgmr.msra.gmra.mrb[8].mxu1 %v620_v42 }
 0x1c3   :  { %952 = vmatpush1.xpose.msra.mxu0 %v793_v3  ;;  %1022 = vmatpush1.xpose.msra.mxu1 %v800_v7  ;;  %v112_v7 = vadd.f32 %v111_v62, %v106_v63 }
 0x1c4   :  { %1135 = vmatprep.subr.mxu0 %v1108_v47  ;;  %1205 = vmatprep.subr.mxu1 %v1109_v49 }
 0x1cf   :  { %v691_v9 = vpop.f32.mrb[6].mxu0  ;;  %v762_v13 = vpop.f32.mrb[6].mxu1 }
 0x1d0   :  { %v693_v1 = vpop.f32.mrb[7].mxu0  ;;  %v764_v14 = vpop.f32.mrb[7].mxu1 }
 0x1d1   :  { %1015 = vmatprep.mubr.f32.mxu0 %v693_v1  ;;  %1085 = vmatprep.mubr.f32.mxu1 %v764_v14 }
 0x1d2   :  { %1016 = vmatmul.mubr.f32.vlgmr.msra.gmra.mrb[10].mxu0 %v691_v9  ;;  %1086 = vmatmul.mubr.f32.vlgmr.msra.gmra.mrb[10].mxu1 %v762_v13 }
 0x1d3   :  { %1136 = vmatpush1.xpose.msra.mxu0 %v1100_v36  ;;  %1199 = vmatprep.mubr.f32.mxu0 %v264_v16 }
 0x1d4   :  { %1206 = vmatpush1.xpose.msra.mxu1 %v1107_v37  ;;  %1269 = vmatprep.mubr.f32.mxu1 %v335_v17  ;;  %v1419_v17 = vrot.slane %v112_v7, %v1418_v8 }
 0x1d5   :  { %1275 = vmatprep.subr.mxu0 %v1125_v18  ;;  %1345 = vmatprep.subr.mxu1 %v1126_v23 }
 0x1d6   :  { %1200 = vmatmul.mubr.f32.vlgmr.msra.gmra.mrb[12].mxu0 %v262_v11 }
 0x1d7   :  { %1270 = vmatmul.mubr.f32.vlgmr.msra.gmra.mrb[12].mxu1 %v333_v12  ;;  %1276 = vmatpush1.xpose.msra.mxu0 %v1117_v59 }
 0x1d8   :  { %1339 = vmatprep.mubr.f32.mxu0 %v406_v26  ;;  %1346 = vmatpush1.xpose.msra.mxu1 %v1124_v5 }
 0x1d9   :  { %1409 = vmatprep.mubr.f32.mxu1 %v477_v27 }
 0x1da   :  { %1340 = vmatmul.mubr.f32.vlgmr.msra.gmra.mrb[14].mxu0 %v404_v22 }
 0x1db   :  { %1410 = vmatmul.mubr.f32.vlgmr.msra.gmra.mrb[14].mxu1 %v475_v25 }
 0x295   :  { %v877_v32 = vpop.f32.mrb[8].mxu0  ;;  %v947_v33 = vpop.f32.mrb[8].mxu1 }
 0x296   :  { %v948_v43 = vadd.f32 %v947_v33, %v877_v32  ;;  %v879_v44 = vpop.f32.mrb[9].mxu0  ;;  %v949_v48 = vpop.f32.mrb[9].mxu1 }
 0x2a5   :  { %v1017_v56 = vpop.f32.mrb[10].mxu0  ;;  %v1087_v57 = vpop.f32.mrb[10].mxu1 }
 0x2a6   :  { %v1018_v60 = vadd.f32 %v1017_v56, %v948_v43  ;;  %v1019_v58 = vpop.f32.mrb[11].mxu0  ;;  %v1089_v61 = vpop.f32.mrb[11].mxu1 }
 0x2a8   :  { %v1088_v0 = vadd.f32 %v1087_v57, %v1018_v60 }
 0x2a9   :  { %v1201_v2 = vpop.f32.mrb[12].mxu0 }
 0x2aa   :  { %v1202_v3 = vadd.f32 %v1201_v2, %v1088_v0  ;;  %v1271_v4 = vpop.f32.mrb[12].mxu1  ;;  %v1203_v6 = vpop.f32.mrb[13].mxu0 }
 0x2ab   :  { %v1273_v10 = vpop.f32.mrb[13].mxu1 }
 0x2ac   :  { %v1272_v11 = vadd.f32 %v1271_v4, %v1202_v3 }
 0x2ad   :  { %v1341_v12 = vpop.f32.mrb[14].mxu0 }
 0x2ae   :  { %v1342_v15 = vadd.f32 %v1341_v12, %v1272_v11  ;;  %v1411_v16 = vpop.f32.mrb[14].mxu1  ;;  %v1343_v19 = vpop.f32.mrb[15].mxu0 }
 0x2af   :  { %v1413_v20 = vpop.f32.mrb[15].mxu1 }
 0x2b0   :  { %v1412_v21 = vadd.f32 %v1411_v16, %v1342_v15 }
 0x2b2   :  { %v1421_v22 = vadd.f32 %v1419_v17, %v1412_v21 }
 0x2b4   :  { %1423 = vst.msk [vmem:[%s1960_s8] sm:$0xff] %vm1422_vm3, %v1421_v22 }
 0x2b5   :  { %1428 = vsyncpa [#allocation3], 1 }
 0x2b6   :  { %1429 = vsyncpa [#allocation5], 1 }
 0x2b7   :  { %1430 = vsyncpa [#allocation8], 1 }

</bundles_post_ra>
